<compile_context>
chip_gen: v7x
topology: tpu7x:2x2x1
jax: 0.10.0
libtpu: 0.0.40
codegen_flags: <defaults>
</compile_context>

<pallas_src>
import functools

import jax
import jax.numpy as jnp
from jax.experimental import pallas as pl
from jax.experimental.pallas import tpu as pltpu


def _round_up(v, m):
    return ((v + m - 1) // m) * m


def _vmem_budget_bytes():
    """Scoped-VMEM budget = half of physical VMEM (v5e/v6e: ~64 MiB, v7x: ~32 MiB)."""
    phys = 64 * 1024 * 1024  # conservative fallback (v7x physical)
    try:
        info = pltpu.get_tpu_info()
        phys = int(getattr(info, "vmem_capacity_bytes", phys))
    except Exception:
        pass
    return min(phys // 2, 64 * 1024 * 1024)


def _num_tensorcores():
    """2 on v7x-class chips (megacore), else 1.  Grid splitting only helps with 2 TCs."""
    try:
        kind = jax.devices()[0].device_kind.lower()
    except Exception:
        return 1
    return 2 if "v7" in kind else 1


def _pick_batch_tile(B, D, L, C_pad, *, vmem_budget, x_elem_bytes,
                     max_unroll=64, target_x_block_bytes=4 * 1024 * 1024):
    """Batch elements per grid step (TB), budgeting total live VMEM in bytes.

    Live set per step (bytes):
      - x block, double-buffered by the pipeline:      2 * TB * D * L * x_elem_bytes
      - per-iteration intermediates (xt f32/bf16, sy/s/y/p/p*y), lane-padded to
        >= 128 lanes; these do NOT scale with TB (the in-kernel loop reuses them).
      - resident weights / bias / output block (small).
    TB is also capped so the unrolled in-kernel loop stays short.
    """
    per_batch_x = D * L * x_elem_bytes
    lanes = max(L, 128)
    inter = (2 * D + 6 * C_pad) * lanes * 4
    fixed = 2 * C_pad * D * 2 + C_pad * 128 * 4 + inter + (1 << 20)  # +1 MiB slack

    divisors = [d for d in range(1, B + 1) if B % d == 0]
    ok = [d for d in divisors
          if d <= max_unroll and 2 * d * per_batch_x + fixed <= vmem_budget]
    if not ok:
        ok = [1]
    tb = ok[-1]                                   # largest tile that fits
    for d in ok:                                  # ...but stop once the x block is big enough
        if d * per_batch_x >= target_x_block_bytes:
            tb = d
            break
    # Only v7x-class chips have 2 TensorCores: keep >= 2 grid steps there so the
    # "parallel" grid axis can be sharded.  On v5e/v6e a single big step is best.
    if _num_tensorcores() >= 2 and tb == B and B > 1:
        smaller = [d for d in ok if d < B]
        if smaller:
            tb = smaller[-1]
    return tb


def _caml_kernel(x_ref, w12_ref, b2_ref, o_ref, *, tb, c_pad):
    # x_ref  : [TB, D, L]  (native layout, bf16 stream)
    # w12_ref: [2*C_pad, D] bf16 (rows 0:C = W1, rows C_pad:C_pad+C = W2)
    # b2_ref : [C_pad, 1]  f32
    # o_ref  : [1, C_pad, TB] f32
    w12 = w12_ref[...]                                          # resident weights
    b2 = b2_ref[...]                                            # [C_pad, 1]
    for b in range(tb):                                         # static unroll over batch tile
        # tanh in f32 (portable across v5e/v6e/v7x); MXU operands in bf16.
        xt = jnp.tanh(x_ref[b].astype(jnp.float32))             # [D, L], L on lanes
        sy = jnp.dot(w12, xt.astype(jnp.bfloat16),
                     preferred_element_type=jnp.float32)        # [2*C_pad, L]
        s = sy[:c_pad, :]                                       # scores   [C_pad, L]
        y = sy[c_pad:, :]                                       # values   [C_pad, L]
        # Per-class softmax over L (lane axis), fused with the sum over L.
        m = jnp.max(s, axis=-1, keepdims=True)                  # [C_pad, 1]
        p = jnp.exp(s - m)                                      # [C_pad, L]
        denom = jnp.sum(p, axis=-1, keepdims=True)              # [C_pad, 1]
        num = jnp.sum(p * y, axis=-1, keepdims=True)            # [C_pad, 1]
        col = num / denom + b2                                  # exact reciprocal (tiny tensor)
        o_ref[0, :, b:b + 1] = col.astype(o_ref.dtype)


def caml_attention(x, w1, w2, b2, *, tb=None, x_stream_dtype=jnp.bfloat16):
    """x: [B, D, L]; w1, w2: [C, D]; b2: [C] -> [B, C] (float32)."""
    B, D, L = x.shape
    C = w1.shape[0]
    C_pad = _round_up(C, 8)

    vmem_budget = _vmem_budget_bytes()
    x_elem_bytes = jnp.dtype(x_stream_dtype).itemsize
    TB = tb if tb is not None else _pick_batch_tile(
        B, D, L, C_pad, vmem_budget=vmem_budget, x_elem_bytes=x_elem_bytes)
    assert B % TB == 0
    G = B // TB

    # Stream x in its NATIVE layout (no transpose) and in bf16 (no-op if the
    # producer already emits bf16, which is the intended production path).
    x_in = x.astype(x_stream_dtype)

    # Fused, sublane-padded weights: rows [0:C)=W1, rows [C_pad:C_pad+C)=W2,
    # zero-padded rows elsewhere -> in-kernel s/y split is an aligned slice.
    w12 = jnp.zeros((2 * C_pad, D), jnp.float32)
    w12 = w12.at[:C, :].set(w1.astype(jnp.float32))
    w12 = w12.at[C_pad:C_pad + C, :].set(w2.astype(jnp.float32))
    w12 = w12.astype(jnp.bfloat16)

    b2_col = jnp.zeros((C_pad, 1), jnp.float32).at[:C, 0].set(b2.astype(jnp.float32))

    kernel = functools.partial(_caml_kernel, tb=TB, c_pad=C_pad)

    out3 = pl.pallas_call(
        kernel,
        out_shape=jax.ShapeDtypeStruct((G, C_pad, TB), jnp.float32),
        grid_spec=pltpu.PrefetchScalarGridSpec(
            num_scalar_prefetch=0,
            grid=(G,),
            in_specs=[
                pl.BlockSpec((TB, D, L), lambda i: (i, 0, 0)),      # native x slab
                pl.BlockSpec((2 * C_pad, D), lambda i: (0, 0)),     # resident fused weights
                pl.BlockSpec((C_pad, 1), lambda i: (0, 0)),         # bias column
            ],
            out_specs=pl.BlockSpec((1, C_pad, TB), lambda i: (i, 0, 0)),
        ),
        compiler_params=pltpu.CompilerParams(
            dimension_semantics=("parallel",),
            vmem_limit_bytes=vmem_budget,
        ),
    )(x_in, w12, b2_col)

    # Tiny layout fixup (B * C_pad * 4 bytes) outside the kernel.
    return jnp.transpose(out3, (0, 2, 1)).reshape(B, C_pad)[:, :C]


def caml_attention_ref(x, w1, w2, b2):
    xt = jnp.tanh(x)                                               # [B, D, L]
    s = jnp.einsum("cd,bdl->bcl", w1, xt)                          # [B, C, L]
    w = jax.nn.softmax(s, axis=2)
    wo = jnp.einsum("bcl,bld->bcd", w, jnp.swapaxes(xt, 1, 2))     # [B, C, D]
    return jnp.sum(w2[None] * wo, axis=2) + b2[None]               # [B, C]


if __name__ == "__main__":
    B, D, L, C = 2, 32, 8, 8   # batch, input_size, seq_len, num_classes

    key = jax.random.PRNGKey(0)
    kx, kw1, kw2, kb2 = jax.random.split(key, 4)

    x = jax.random.normal(kx, (B, D, L), dtype=jnp.float32)

    # xavier_uniform_ for both linear weights: U(-a, a), a = sqrt(6/(fan_in+fan_out))
    bound = (6.0 / (D + C)) ** 0.5
    w1 = jax.random.uniform(kw1, (C, D), minval=-bound, maxval=bound, dtype=jnp.float32)
    w2 = jax.random.uniform(kw2, (C, D), minval=-bound, maxval=bound, dtype=jnp.float32)
    # second_linear.bias keeps the default nn.Linear init: U(-1/sqrt(D), 1/sqrt(D))
    bb = 1.0 / (D ** 0.5)
    b2 = jax.random.uniform(kb2, (C,), minval=-bb, maxval=bb, dtype=jnp.float32)

    out = jax.jit(caml_attention)(x, w1, w2, b2)
    out = jax.block_until_ready(out)

    ref = caml_attention_ref(x, w1, w2, b2)
    assert out.shape == (B, C)
    # Tolerance covers the deliberate bf16 streaming of x / bf16 MXU operands
    # (per the performance review); the fusion itself is mathematically exact.
    assert jnp.allclose(out, ref, atol=2e-2, rtol=2e-2), float(jnp.max(jnp.abs(out - ref)))

    print("KERNEL_OK")
</pallas_src>

<mosaic_0001>
module attributes {stable_mosaic.version = 11 : i64} {
  func.func @_caml_kernel(%arg0: i32, %arg1: memref<2x32x8xbf16, #tpu.memory_space<vmem>>, %arg2: memref<16x32xbf16, #tpu.memory_space<vmem>>, %arg3: memref<8x1xf32, #tpu.memory_space<vmem>>, %arg4: memref<1x8x2xf32, #tpu.memory_space<vmem>>) attributes {dimension_semantics = [#tpu.dimension_semantics<parallel>], iteration_bounds = array<i64: 1>, scalar_prefetch = 0 : i64, scratch_operands = 0 : i64, tpu.core_type = #tpu.core_type<tc>, window_params = [{transform_indices = @transform_0, window_bounds = array<i64: 2, 32, 8>}, {pipeline_mode = #tpu.pipeline_mode<synchronous>, transform_indices = @transform_1, window_bounds = array<i64: 16, 32>}, {pipeline_mode = #tpu.pipeline_mode<synchronous>, transform_indices = @transform_2, window_bounds = array<i64: 8, 1>}, {transform_indices = @transform_3, window_bounds = array<i64: 1, 8, 2>}]} {
    %c0 = arith.constant 0 : index
    %c0_0 = arith.constant 0 : index
    %0 = vector.load %arg2[%c0, %c0_0] : memref<16x32xbf16, #tpu.memory_space<vmem>>, vector<16x32xbf16>
    %c0_1 = arith.constant 0 : index
    %c0_2 = arith.constant 0 : index
    %1 = vector.load %arg3[%c0_1, %c0_2] : memref<8x1xf32, #tpu.memory_space<vmem>>, vector<8x1xf32>
    %c0_3 = arith.constant 0 : index
    %c0_4 = arith.constant 0 : index
    %c0_5 = arith.constant 0 : index
    %2 = vector.load %arg1[%c0_3, %c0_4, %c0_5] : memref<2x32x8xbf16, #tpu.memory_space<vmem>>, vector<1x32x8xbf16>
    %3 = vector.shape_cast %2 : vector<1x32x8xbf16> to vector<32x8xbf16>
    %4 = arith.extf %3 : vector<32x8xbf16> to vector<32x8xf32>
    %5 = math.tanh %4 : vector<32x8xf32>
    %6 = arith.truncf %5 : vector<32x8xf32> to vector<32x8xbf16>
    %cst = arith.constant dense<0.000000e+00> : vector<16x8xf32>
    %7 = tpu.matmul %0, %6, %cst {dimension_numbers = #tpu.dot_dimension_numbers<[1], [0], [0], [1], [0, 0, 1, 1], [], []>} : vector<16x32xbf16>, vector<32x8xbf16>, vector<16x8xf32> -> vector<16x8xf32>
    %8 = vector.extract_strided_slice %7 {offsets = [0, 0], sizes = [8, 8], strides = [1, 1]} : vector<16x8xf32> to vector<8x8xf32>
    %9 = vector.extract_strided_slice %7 {offsets = [8, 0], sizes = [8, 8], strides = [1, 1]} : vector<16x8xf32> to vector<8x8xf32>
    %cst_6 = arith.constant dense<0xFF800000> : vector<8xf32>
    %10 = vector.multi_reduction <maximumf>, %8, %cst_6 [1] : vector<8x8xf32> to vector<8xf32>
    %11 = vector.shape_cast %10 : vector<8xf32> to vector<8x1xf32>
    %12 = vector.broadcast %11 : vector<8x1xf32> to vector<8x8xf32>
    %13 = arith.subf %8, %12 : vector<8x8xf32>
    %14 = math.exp %13 : vector<8x8xf32>
    %cst_7 = arith.constant dense<0.000000e+00> : vector<8xf32>
    %15 = vector.multi_reduction <add>, %14, %cst_7 [1] : vector<8x8xf32> to vector<8xf32>
    %16 = vector.shape_cast %15 : vector<8xf32> to vector<8x1xf32>
    %17 = arith.mulf %14, %9 : vector<8x8xf32>
    %cst_8 = arith.constant dense<0.000000e+00> : vector<8xf32>
    %18 = vector.multi_reduction <add>, %17, %cst_8 [1] : vector<8x8xf32> to vector<8xf32>
    %19 = vector.shape_cast %18 : vector<8xf32> to vector<8x1xf32>
    %20 = arith.divf %19, %16 : vector<8x1xf32>
    %21 = arith.addf %20, %1 : vector<8x1xf32>
    %c0_9 = arith.constant 0 : index
    %c0_10 = arith.constant 0 : index
    %c0_11 = arith.constant 0 : index
    %22 = vector.load %arg4[%c0_9, %c0_10, %c0_11] : memref<1x8x2xf32, #tpu.memory_space<vmem>>, vector<1x8x1xf32>
    %23 = vector.shape_cast %22 : vector<1x8x1xf32> to vector<8x1xf32>
    %24 = vector.shape_cast %21 : vector<8x1xf32> to vector<1x8x1xf32>
    tpu.vector_store %arg4[%c0_9, %c0_10, %c0_11], %24 {strides = array<i32>} : memref<1x8x2xf32, #tpu.memory_space<vmem>>, vector<1x8x1xf32>,
    %c1 = arith.constant 1 : index
    %c0_12 = arith.constant 0 : index
    %c0_13 = arith.constant 0 : index
    %25 = vector.load %arg1[%c1, %c0_12, %c0_13] : memref<2x32x8xbf16, #tpu.memory_space<vmem>>, vector<1x32x8xbf16>
    %26 = vector.shape_cast %25 : vector<1x32x8xbf16> to vector<32x8xbf16>
    %27 = arith.extf %26 : vector<32x8xbf16> to vector<32x8xf32>
    %28 = math.tanh %27 : vector<32x8xf32>
    %29 = arith.truncf %28 : vector<32x8xf32> to vector<32x8xbf16>
    %cst_14 = arith.constant dense<0.000000e+00> : vector<16x8xf32>
    %30 = tpu.matmul %0, %29, %cst_14 {dimension_numbers = #tpu.dot_dimension_numbers<[1], [0], [0], [1], [0, 0, 1, 1], [], []>} : vector<16x32xbf16>, vector<32x8xbf16>, vector<16x8xf32> -> vector<16x8xf32>
    %31 = vector.extract_strided_slice %30 {offsets = [0, 0], sizes = [8, 8], strides = [1, 1]} : vector<16x8xf32> to vector<8x8xf32>
    %32 = vector.extract_strided_slice %30 {offsets = [8, 0], sizes = [8, 8], strides = [1, 1]} : vector<16x8xf32> to vector<8x8xf32>
    %cst_15 = arith.constant dense<0xFF800000> : vector<8xf32>
    %33 = vector.multi_reduction <maximumf>, %31, %cst_15 [1] : vector<8x8xf32> to vector<8xf32>
    %34 = vector.shape_cast %33 : vector<8xf32> to vector<8x1xf32>
    %35 = vector.broadcast %34 : vector<8x1xf32> to vector<8x8xf32>
    %36 = arith.subf %31, %35 : vector<8x8xf32>
    %37 = math.exp %36 : vector<8x8xf32>
    %cst_16 = arith.constant dense<0.000000e+00> : vector<8xf32>
    %38 = vector.multi_reduction <add>, %37, %cst_16 [1] : vector<8x8xf32> to vector<8xf32>
    %39 = vector.shape_cast %38 : vector<8xf32> to vector<8x1xf32>
    %40 = arith.mulf %37, %32 : vector<8x8xf32>
    %cst_17 = arith.constant dense<0.000000e+00> : vector<8xf32>
    %41 = vector.multi_reduction <add>, %40, %cst_17 [1] : vector<8x8xf32> to vector<8xf32>
    %42 = vector.shape_cast %41 : vector<8xf32> to vector<8x1xf32>
    %43 = arith.divf %42, %39 : vector<8x1xf32>
    %44 = arith.addf %43, %1 : vector<8x1xf32>
    %c0_18 = arith.constant 0 : index
    %c0_19 = arith.constant 0 : index
    %c1_20 = arith.constant 1 : index
    %45 = vector.load %arg4[%c0_18, %c0_19, %c1_20] : memref<1x8x2xf32, #tpu.memory_space<vmem>>, vector<1x8x1xf32>
    %46 = vector.shape_cast %45 : vector<1x8x1xf32> to vector<8x1xf32>
    %47 = vector.shape_cast %44 : vector<8x1xf32> to vector<1x8x1xf32>
    tpu.vector_store %arg4[%c0_18, %c0_19, %c1_20], %47 {strides = array<i32>} : memref<1x8x2xf32, #tpu.memory_space<vmem>>, vector<1x8x1xf32>,
    return
  }
  func.func @transform_0(%arg0: i32) -> (i32, i32, i32) {
    %c0_i32 = arith.constant 0 : i32
    %c0_i32_0 = arith.constant 0 : i32
    %c0_i32_1 = arith.constant 0 : i32
    return %arg0, %c0_i32, %c0_i32_0 : i32, i32, i32
  }
  func.func @transform_1(%arg0: i32) -> (i32, i32) {
    %c0_i32 = arith.constant 0 : i32
    %c0_i32_0 = arith.constant 0 : i32
    %c0_i32_1 = arith.constant 0 : i32
    return %c0_i32, %c0_i32_0 : i32, i32
  }
  func.func @transform_2(%arg0: i32) -> (i32, i32) {
    %c0_i32 = arith.constant 0 : i32
    %c0_i32_0 = arith.constant 0 : i32
    %c0_i32_1 = arith.constant 0 : i32
    return %c0_i32, %c0_i32_0 : i32, i32
  }
  func.func @transform_3(%arg0: i32) -> (i32, i32, i32) {
    %c0_i32 = arith.constant 0 : i32
    %c0_i32_0 = arith.constant 0 : i32
    %c0_i32_1 = arith.constant 0 : i32
    return %arg0, %c0_i32, %c0_i32_0 : i32, i32, i32
  }
}

</mosaic_0001>

<bundles_post_ra>
// kernel: caml_attention.1
= control target key start
LH: loop header
LB: loop body
LE: loop exit
PB: predicated region body
PF: predicated region fallthrough
CT: control target
= control target key end

     0   :  { %v259_v0 = vmov 0.0   ;;  %vm260_vm0 = vmmov 0   ;;  %vm37_vm1 = vcmask 261120   ;;  %vm82_vm2 = vcmask 64512   ;;  %s261_s22 = smov 1   ;;  %s312_s0 = inlined_call_operand.vmem [shape: bf16[2,32,8], index: 0, kind: input, shape index: {}]   ;;  %s313_s1 = inlined_call_operand.vmem [shape: bf16[16,32], index: 1, kind: input, shape index: {}]   ;;  %s314_s2 = inlined_call_operand.vmem [shape: f32[8,1], index: 2, kind: input, shape index: {}]   ;;  %s315_s3 = inlined_call_operand.vmem [shape: f32[1,8,2], index: 3, kind: output, shape index: {}]  }
   0x1   :  { %223 = vmatprep.subr.bf16.mxu1 %v259_v0  ;;  %v207_v1 = vld [vmem:[%s312_s0 + $0x10] sm:$0xff]   ;;  %215 = vmatprep.subr.bf16.mxu0 %v259_v0  ;;  %v191_v2 = vld [vmem:[%s312_s0] sm:$0xff]   ;;  %v208_v3 = vld [vmem:[%s312_s0 + $0x18] sm:$0xff]   ;;  %vm99_vm3 = vcmask 7168   ;;  %vm177_vm4 = vcmask 15368  }
   0x2   :  { %v200_v4 = vunpack.c.l.bf16 %v207_v1  ;;  %v201_v5 = vunpack.c.h.bf16 %v207_v1  ;;  %v192_v6 = vunpack.c.l.bf16 %v191_v2  ;;  %227 = vmatprep.mubr.msk.bf16.mxu1 %vm260_vm0, %v259_v0  ;;  %219 = vmatprep.mubr.msk.bf16.mxu0 %vm260_vm0, %v259_v0  ;;  %v193_v7 = vunpack.c.h.bf16 %v191_v2  ;;  %v206_v8 = vld [vmem:[%s312_s0 + $0x8] sm:$0xff]   ;;  %v234_v24 = vld [vmem:[%s313_s1] sm:$0xff]  }
   0x3   :  { %v204_v9 = vunpack.c.l.bf16 %v208_v3  ;;  %v205_v10 = vunpack.c.h.bf16 %v208_v3  ;;  %v196_v11 = vunpack.c.l.bf16 %v206_v8  ;;  %v197_v12 = vunpack.c.h.bf16 %v206_v8  ;;  %v17_v54 = vld [vmem:[%s314_s2] sm:$0xff] }
   0x4   :  { %235 = vtanh.f32 %v200_v4 }
   0x5   :  { %237 = vtanh.f32 %v201_v5 }
   0x6   :  { %239 = vtanh.f32 %v192_v6 }
   0x7   :  { %241 = vtanh.f32 %v193_v7 }
   0x8   :  { %243 = vtanh.f32 %v204_v9 }
   0x9   :  { %245 = vtanh.f32 %v205_v10 }
   0xa   :  { %247 = vtanh.f32 %v196_v11 }
   0xb   :  { %249 = vtanh.f32 %v197_v12 }
   0xe   :  { %v236_v13 = vpop.eup %235 }
   0xf   :  { %v238_v14 = vpop.eup %237 }
  0x10   :  { %v240_v15 = vpop.eup %239  ;;  %v114_v16 = vpack.c.bf16 %v238_v14, %v236_v13 }
  0x11   :  { %v242_v17 = vpop.eup %241 }
  0x12   :  { %v244_v18 = vpop.eup %243  ;;  %224 = vmatpush3.bf16.msra.mxu1 %v114_v16  ;;  %v30_v19 = vpack.c.bf16 %v242_v17, %v240_v15 }
  0x13   :  { %v246_v20 = vpop.eup %245  ;;  %225 = vmatprep.subr.bf16.mxu1 %v259_v0 }
  0x14   :  { %v248_v21 = vpop.eup %247  ;;  %216 = vmatpush3.bf16.msra.mxu0 %v30_v19  ;;  %v115_v22 = vpack.c.bf16 %v246_v20, %v244_v18 }
  0x15   :  { %v250_v23 = vpop.eup %249  ;;  %217 = vmatprep.subr.bf16.mxu0 %v259_v0 }
  0x16   :  { %226 = vmatpush3.bf16.msra.mxu1 %v115_v22  ;;  %v31_v25 = vpack.c.bf16 %v250_v23, %v248_v21 }
  0x18   :  { %218 = vmatpush3.bf16.msra.mxu0 %v31_v25 }
  0x19   :  { %228 = vmatmul.mubr.msk.bf16.vlgmr.msra.gmra.mrb[0].mxu1 %vm37_vm1, %v234_v24 }
  0x1b   :  { %220 = vmatmul.mubr.msk.bf16.vlgmr.msra.gmra.mrb[0].mxu0 %vm37_vm1, %v234_v24 }
  0xec   :  { %v150_v26 = vpop.f32.mrb[0].mxu1 }
  0xed   :  { %v229_v27 = vpop.f32.mrb[1].mxu1  ;;  %v157_v28 = vsel %vm82_vm2, %v150_v26, -inf }
  0xee   :  { %158 = vmax.xlane.f32.xlu0 %v157_v28  ;;  %v153_v29 = vpop.f32.mrb[2].mxu1  ;;  %v75_v30 = vpop.f32.mrb[0].mxu0 }
  0xef   :  { %v230_v31 = vpop.f32.mrb[3].mxu1  ;;  %v83_v32 = vsel %vm82_vm2, %v75_v30, -inf  ;;  %v221_v33 = vpop.f32.mrb[1].mxu0 }
  0xf0   :  { %v78_v34 = vpop.f32.mrb[2].mxu0 }
  0xf1   :  { %v222_v35 = vpop.f32.mrb[3].mxu0 }
  0xf2   :  { %84 = vmax.xlane.f32.xlu0 %v83_v32 }
 0x17b   :  { %v159_v36 = vpop.xlane.xlu0 %158 }
 0x17c   :  { %v160_v37 = vsub.f32 %v150_v26, %v159_v36 }
 0x17e   :  { %v161_v38 = vmul.f32 1.442695, %v160_v37 }
 0x17f   :  { %v85_v39 = vpop.xlane.xlu0 %84 }
 0x180   :  { %251 = vpow2.f32 %v161_v38  ;;  %v86_v40 = vsub.f32 %v75_v30, %v85_v39 }
 0x182   :  { %v87_v41 = vmul.f32 1.442695, %v86_v40 }
 0x184   :  { %253 = vpow2.f32 %v87_v41 }
 0x18a   :  { %v252_v42 = vpop.eup %251 }
 0x18b   :  { %v163_v43 = vsel %vm82_vm2, %v252_v42, 0.0  ;;  %v166_v44 = vmul.f32 %v252_v42, %v153_v29 }
 0x18c   :  { %164 = vadd.xlane.f32.xlu1 %v163_v43 }
 0x18d   :  { %v167_v46 = vsel %vm82_vm2, %v166_v44, 0.0 }
 0x18e   :  { %v254_v45 = vpop.eup %253 }
 0x18f   :  { %v89_v47 = vsel %vm82_vm2, %v254_v45, 0.0  ;;  %v92_v48 = vmul.f32 %v254_v45, %v78_v34 }
 0x190   :  { %168 = vadd.xlane.f32.xlu1 %v167_v46  ;;  %90 = vadd.xlane.f32.xlu0 %v89_v47 }
 0x191   :  { %v93_v49 = vsel %vm82_vm2, %v92_v48, 0.0 }
 0x194   :  { %94 = vadd.xlane.f32.xlu1 %v93_v49 }
 0x219   :  { %v165_v50 = vpop.xlane.xlu1 %164 }
 0x21a   :  { %255 = vrcp.f32 %v165_v50 }
 0x21d   :  { %v91_v51 = vpop.xlane.xlu0 %90  ;;  %v169_v52 = vpop.xlane.xlu1 %168 }
 0x21e   :  { %257 = vrcp.f32 %v91_v51 }
 0x221   :  { %v95_v58 = vpop.xlane.xlu1 %94 }
 0x224   :  { %v256_v53 = vpop.eup %255 }
 0x225   :  { %v171_v55 = vmul.f32 %v256_v53, %v169_v52 }
 0x227   :  { %v172_v56 = vadd.f32 %v171_v55, %v17_v54 }
 0x228   :  { %v258_v57 = vpop.eup %257 }
 0x229   :  { %v97_v59 = vmul.f32 %v258_v57, %v95_v58  ;;  %174 = vrot.lane.b32.xlu0 %v172_v56, %s261_s22 }
 0x22b   :  { %v98_v60 = vadd.f32 %v97_v59, %v17_v54 }
 0x22d   :  { %100 = vst.msk [vmem:[%s315_s3] sm:$0xff] %vm99_vm3, %v98_v60 }
 0x29b   :  { %v175_v61 = vpop.permute.xlu0 %174 }
 0x29c   :  { %178 = vst.msk [vmem:[%s315_s3] sm:$0xff] %vm177_vm4, %v175_v61 }

</bundles_post_ra>
